<compile_context>
chip_gen: v5e
topology: v5e:2x2
jax: 0.10.0
libtpu: 0.0.40
codegen_flags: <defaults>
</compile_context>

<pallas_src>
import functools

import jax
import jax.numpy as jnp
from jax import lax
from jax.experimental import pallas as pl
from jax.experimental.pallas import tpu as pltpu


# ---------------------------------------------------------------------------
# Fused SE kernel: one grid step == one image.
#   x_ref : (1, C, HW)   activations, lane-dense on HW
#   w1_ref: (mid, C)     fc[0].weight (PyTorch layout, no bias)
#   w2_ref: (C, mid)     fc[2].weight (PyTorch layout, no bias)
#   o_ref : (1, C, HW)
# ---------------------------------------------------------------------------
def _se_kernel(x_ref, w1_ref, w2_ref, o_ref, *, inv_hw):
    x = x_ref[0].astype(jnp.float32)                         # (C, HW)

    # Global average pool over the spatial (lane) axis -> (C, 1).
    pooled = jnp.sum(x, axis=1, keepdims=True) * inv_hw      # (C, 1)

    # Squeeze-excite MLP: FC1 -> ReLU -> FC2 -> sigmoid, all on-chip.
    h = jnp.dot(w1_ref[...].astype(jnp.float32), pooled,
                preferred_element_type=jnp.float32)           # (mid, 1)
    h = jnp.maximum(h, 0.0)
    s = jnp.dot(w2_ref[...].astype(jnp.float32), h,
                preferred_element_type=jnp.float32)           # (C, 1)
    gate = 1.0 / (1.0 + jnp.exp(-s))                          # sigmoid, (C, 1)

    # Channel-wise rescale (gate broadcasts across the lane axis).
    o_ref[0] = (x * gate).astype(o_ref.dtype)


def se_layer_pallas(x_nchw, w1, w2):
    """SELayer forward.

    x_nchw: (B, C, H, W) activations (PyTorch NCHW).
    w1    : (C // reduction, C)  = fc[0].weight  (Linear, bias=False)
    w2    : (C, C // reduction)  = fc[2].weight  (Linear, bias=False)
    """
    B, C, H, W = x_nchw.shape
    HW = H * W
    mid = w1.shape[0]
    assert w1.shape == (mid, C) and w2.shape == (C, mid)
    assert C % 8 == 0 and HW % 128 == 0, "C multiple of 8, H*W multiple of 128"

    x_flat = x_nchw.reshape(B, C, HW)  # free reshape, no transpose

    grid_spec = pltpu.PrefetchScalarGridSpec(
        num_scalar_prefetch=0,
        grid=(B,),
        in_specs=[
            pl.BlockSpec((1, C, HW), lambda b: (b, 0, 0)),
            pl.BlockSpec((mid, C), lambda b: (0, 0)),
            pl.BlockSpec((C, mid), lambda b: (0, 0)),
        ],
        out_specs=pl.BlockSpec((1, C, HW), lambda b: (b, 0, 0)),
    )

    out_flat = pl.pallas_call(
        functools.partial(_se_kernel, inv_hw=1.0 / HW),
        out_shape=jax.ShapeDtypeStruct((B, C, HW), x_nchw.dtype),
        grid_spec=grid_spec,
        compiler_params=pltpu.CompilerParams(
            dimension_semantics=("parallel",)),
    )(x_flat, w1.astype(jnp.float32), w2.astype(jnp.float32))

    return out_flat.reshape(B, C, H, W)


# ---------------------------------------------------------------------------
# Pure-JAX reference (mirrors the PyTorch SELayer forward exactly).
# ---------------------------------------------------------------------------
def se_layer_ref(x, w1, w2):
    y = jnp.mean(x, axis=(2, 3))                                  # (B, C)
    h = jnp.maximum(
        jnp.dot(y, w1.T, precision=lax.Precision.HIGHEST), 0.0)   # (B, mid)
    s = jnp.dot(h, w2.T, precision=lax.Precision.HIGHEST)         # (B, C)
    gate = 1.0 / (1.0 + jnp.exp(-s))
    return x * gate[:, :, None, None]


if __name__ == "__main__":
    key = jax.random.PRNGKey(0)
    kx, k1, k2 = jax.random.split(key, 3)

    # Small shapes consistent with SELayer(channel=64, reduction=16).
    B, C, H, W = 2, 64, 16, 16
    reduction = 16
    mid = C // reduction

    x = jax.random.normal(kx, (B, C, H, W), jnp.float32)
    w1 = 0.5 * jax.random.normal(k1, (mid, C), jnp.float32)   # fc[0].weight
    w2 = 0.5 * jax.random.normal(k2, (C, mid), jnp.float32)   # fc[2].weight

    out = jax.jit(se_layer_pallas)(x, w1, w2)
    out = jax.block_until_ready(out)
    assert out.shape == (B, C, H, W)

    ref = se_layer_ref(x, w1, w2)
    max_err = float(jnp.max(jnp.abs(out - ref)))
    assert max_err < 1e-3, f"max abs err {max_err}"

    print("KERNEL_OK")
</pallas_src>

<mosaic_0001>
module attributes {stable_mosaic.version = 11 : i64} {
  func.func @_se_kernel(%arg0: i32, %arg1: memref<1x64x256xf32, #tpu.memory_space<vmem>>, %arg2: memref<4x64xf32, #tpu.memory_space<vmem>>, %arg3: memref<64x4xf32, #tpu.memory_space<vmem>>, %arg4: memref<1x64x256xf32, #tpu.memory_space<vmem>>) attributes {dimension_semantics = [#tpu.dimension_semantics<parallel>], iteration_bounds = array<i64: 2>, scalar_prefetch = 0 : i64, scratch_operands = 0 : i64, tpu.core_type = #tpu.core_type<tc>, window_params = [{transform_indices = @transform_0, window_bounds = array<i64: 1, 64, 256>}, {pipeline_mode = #tpu.pipeline_mode<synchronous>, transform_indices = @transform_1, window_bounds = array<i64: 4, 64>}, {pipeline_mode = #tpu.pipeline_mode<synchronous>, transform_indices = @transform_2, window_bounds = array<i64: 64, 4>}, {transform_indices = @transform_3, window_bounds = array<i64: 1, 64, 256>}]} {
    %c0 = arith.constant 0 : index
    %c0_0 = arith.constant 0 : index
    %c0_1 = arith.constant 0 : index
    %0 = vector.load %arg1[%c0, %c0_0, %c0_1] : memref<1x64x256xf32, #tpu.memory_space<vmem>>, vector<1x64x256xf32>
    %1 = vector.shape_cast %0 : vector<1x64x256xf32> to vector<64x256xf32>
    %cst = arith.constant dense<0.000000e+00> : vector<64xf32>
    %2 = vector.multi_reduction <add>, %1, %cst [1] : vector<64x256xf32> to vector<64xf32>
    %3 = vector.shape_cast %2 : vector<64xf32> to vector<64x1xf32>
    %cst_2 = arith.constant 3.906250e-03 : f32
    %4 = vector.broadcast %cst_2 : f32 to vector<64x1xf32>
    %5 = arith.mulf %3, %4 : vector<64x1xf32>
    %c0_3 = arith.constant 0 : index
    %c0_4 = arith.constant 0 : index
    %6 = vector.load %arg2[%c0_3, %c0_4] : memref<4x64xf32, #tpu.memory_space<vmem>>, vector<4x64xf32>
    %cst_5 = arith.constant dense<0.000000e+00> : vector<4x1xf32>
    %7 = tpu.matmul %6, %5, %cst_5 {dimension_numbers = #tpu.dot_dimension_numbers<[1], [0], [0], [1], [0, 0, 1, 1], [], []>} : vector<4x64xf32>, vector<64x1xf32>, vector<4x1xf32> -> vector<4x1xf32>
    %cst_6 = arith.constant 0.000000e+00 : f32
    %8 = vector.broadcast %cst_6 : f32 to vector<4x1xf32>
    %9 = arith.maximumf %7, %8 : vector<4x1xf32>
    %c0_7 = arith.constant 0 : index
    %c0_8 = arith.constant 0 : index
    %10 = vector.load %arg3[%c0_7, %c0_8] : memref<64x4xf32, #tpu.memory_space<vmem>>, vector<64x4xf32>
    %cst_9 = arith.constant dense<0.000000e+00> : vector<64x1xf32>
    %11 = tpu.matmul %10, %9, %cst_9 {dimension_numbers = #tpu.dot_dimension_numbers<[1], [0], [0], [1], [0, 0, 1, 1], [], []>} : vector<64x4xf32>, vector<4x1xf32>, vector<64x1xf32> -> vector<64x1xf32>
    %cst_10 = arith.constant 0.000000e+00 : f32
    %12 = vector.broadcast %cst_10 : f32 to vector<64x1xf32>
    %13 = arith.subf %12, %11 : vector<64x1xf32>
    %14 = math.exp %13 : vector<64x1xf32>
    %cst_11 = arith.constant 1.000000e+00 : f32
    %15 = vector.broadcast %cst_11 : f32 to vector<64x1xf32>
    %16 = arith.addf %15, %14 : vector<64x1xf32>
    %cst_12 = arith.constant 1.000000e+00 : f32
    %17 = vector.broadcast %cst_12 : f32 to vector<64x1xf32>
    %18 = arith.divf %17, %16 : vector<64x1xf32>
    %19 = vector.broadcast %18 : vector<64x1xf32> to vector<64x256xf32>
    %20 = arith.mulf %1, %19 : vector<64x256xf32>
    %c0_13 = arith.constant 0 : index
    %c0_14 = arith.constant 0 : index
    %c0_15 = arith.constant 0 : index
    %21 = vector.load %arg4[%c0_13, %c0_14, %c0_15] : memref<1x64x256xf32, #tpu.memory_space<vmem>>, vector<1x64x256xf32>
    %22 = vector.shape_cast %21 : vector<1x64x256xf32> to vector<64x256xf32>
    %23 = vector.shape_cast %20 : vector<64x256xf32> to vector<1x64x256xf32>
    tpu.vector_store %arg4[%c0_13, %c0_14, %c0_15], %23 {strides = array<i32>} : memref<1x64x256xf32, #tpu.memory_space<vmem>>, vector<1x64x256xf32>,
    return
  }
  func.func @transform_0(%arg0: i32) -> (i32, i32, i32) {
    %c0_i32 = arith.constant 0 : i32
    %c0_i32_0 = arith.constant 0 : i32
    %c0_i32_1 = arith.constant 0 : i32
    return %arg0, %c0_i32, %c0_i32_0 : i32, i32, i32
  }
  func.func @transform_1(%arg0: i32) -> (i32, i32) {
    %c0_i32 = arith.constant 0 : i32
    %c0_i32_0 = arith.constant 0 : i32
    %c0_i32_1 = arith.constant 0 : i32
    return %c0_i32, %c0_i32_0 : i32, i32
  }
  func.func @transform_2(%arg0: i32) -> (i32, i32) {
    %c0_i32 = arith.constant 0 : i32
    %c0_i32_0 = arith.constant 0 : i32
    %c0_i32_1 = arith.constant 0 : i32
    return %c0_i32, %c0_i32_0 : i32, i32
  }
  func.func @transform_3(%arg0: i32) -> (i32, i32, i32) {
    %c0_i32 = arith.constant 0 : i32
    %c0_i32_0 = arith.constant 0 : i32
    %c0_i32_1 = arith.constant 0 : i32
    return %arg0, %c0_i32, %c0_i32_0 : i32, i32, i32
  }
}

</mosaic_0001>

<bundles_post_ra>
// kernel: se_layer_pallas.1
= control target key start
LH: loop header
LB: loop body
LE: loop exit
PB: predicated region body
PF: predicated region fallthrough
CT: control target
= control target key end

     0   :  { %s700_s12 = smov 0   ;;  %s905_s0 = inlined_call_operand.vmem [shape: f32[2,64,256], index: 0, kind: input, shape index: {}]   ;;  %s906_s1 = inlined_call_operand.vmem [shape: f32[4,64], index: 1, kind: input, shape index: {}]   ;;  %s907_s2 = inlined_call_operand.vmem [shape: f32[64,4], index: 2, kind: input, shape index: {}]   ;;  %s908_s3 = inlined_call_operand.vmem [shape: f32[2,64,256], index: 3, kind: output, shape index: {}]  }
   0x1 LB: > { %s602_s13 = sadd.s32 4294967295, %s677_s12   ;;  %p606_p0 = scmp.ge.s32.totalorder %s677_s12, 1  ;;  %s677_s12 = sphi %s700_s12, %s13_s12  }
   0x2   : > { %p137_p1 = scmp.lt.s32.totalorder %s677_s12, 3 }
   0x4   : > { %p138_p2 = pnand %p606_p0, %p137_p1 }
   0x5   : > { %p161_p3 = scmp.lt.s32.totalorder (!%p138_p2), %s602_s13, 1 }
   0x6   : > { %141 = sbr.rel (%p138_p2) target bundleno = 594 (0x252), region = 32 }
   0xb   : > { %s912_s13 = smov (!%p161_p3, %s602_s13), 1  ;;  %v219_v40 = vld [vmem:[%s906_s1] sm:$0xf]  ;;  %vm220_vm0 = vcmask 523264   ;;  %vm278_vm1 = vcmask 1043456   ;;  %vm253_vm2 = vcmask 31744  }
   0xc   : > { %s623_s14 = sshll.u32 %s912_s13, 7  ;;  %v245_v43 = vld [vmem:[%s907_s2] sm:$0xff]  ;;  %v248_v44 = vld [vmem:[%s907_s2 + $0x18] sm:$0xff]  ;;  %v251_v45 = vld [vmem:[%s907_s2 + $0x30] sm:$0xff]  ;;  %v679_v52 = vmov 0  }
   0xd   : > { %s165_s17 = scalar_lea.vmem %s905_s0, %s623_s14  ;;  %v246_v46 = vld [vmem:[%s907_s2 + $0x8] sm:$0xff]  ;;  %v249_v47 = vld [vmem:[%s907_s2 + $0x20] sm:$0xff]  ;;  %v252_v48 = vld [vmem:[%s907_s2 + $0x38] sm:$0xff]  ;;  %636 = vset.pattern.permute.xlu2 %v679_v52  ;;  %637 = vset.pattern.permute.xlu0 %v679_v52  ;;  %s868_s11 = scalar_lea.vmem %s908_s3, %s623_s14 }
   0xe   : > { %v716_v0 = vld [vmem:[%s165_s17 + $0x70] sm:$0xff]  ;;  %v718_v1 = vld [vmem:[%s165_s17 + $0x78] sm:$0xff]  ;;  %v734_v9 = vld [vmem:[%s165_s17 + $0x60] sm:$0xff]  ;;  %638 = vset.pattern.permute.xlu1 %v679_v52 }
   0xf   : > { %v720_v2 = vld [vmem:[%s165_s17 + $0x50] sm:$0xff]  ;;  %v208_v3 = vadd.f32 %v718_v1, %v716_v0  ;;  %v724_v4 = vld [vmem:[%s165_s17 + $0x58] sm:$0xff]  ;;  %v736_v10 = vld [vmem:[%s165_s17 + $0x68] sm:$0xff] }
  0x10   : > { %v202_v5 = vadd.f32 %v724_v4, %v720_v2  ;;  %v728_v6 = vld [vmem:[%s165_s17 + $0x30] sm:$0xff]  ;;  %v730_v7 = vld [vmem:[%s165_s17 + $0x38] sm:$0xff]  ;;  %v738_v11 = vld [vmem:[%s165_s17 + $0x40] sm:$0xff]  ;;  %v205_v15 = vadd.f32 %v736_v10, %v734_v9 }
  0x11   : > { %209 = vadd.xlane.f32.xlu0 %v208_v3  ;;  %v196_v8 = vadd.f32 %v730_v7, %v728_v6  ;;  %v740_v12 = vld [vmem:[%s165_s17 + $0x48] sm:$0xff]  ;;  %v742_v13 = vld [vmem:[%s165_s17 + $0x20] sm:$0xff]  ;;  %v752_v18 = vld [vmem:[%s165_s17 + $0x10] sm:$0xff] }
  0x12   : > { %203 = vadd.xlane.f32.xlu1 %v202_v5  ;;  %v744_v14 = vld [vmem:[%s165_s17 + $0x28] sm:$0xff]  ;;  %v199_v16 = vadd.f32 %v740_v12, %v738_v11  ;;  %v754_v19 = vld [vmem:[%s165_s17 + $0x18] sm:$0xff]  ;;  %v756_v20 = vld [vmem:[%s165_s17] sm:$0xff] }
  0x13   : > { %197 = vadd.xlane.f32.xlu2 %v196_v8  ;;  %v193_v17 = vadd.f32 %v744_v14, %v742_v13  ;;  %v758_v21 = vld [vmem:[%s165_s17 + $0x8] sm:$0xff]  ;;  %v190_v22 = vadd.f32 %v754_v19, %v752_v18  ;;  %v247_v49 = vld [vmem:[%s907_s2 + $0x10] sm:$0xff] }
  0x14   : > { %v187_v23 = vadd.f32 %v758_v21, %v756_v20  ;;  %v250_v50 = vld [vmem:[%s907_s2 + $0x28] sm:$0xff] }
  0x19   : > { %206 = vadd.xlane.f32.xlu0 %v205_v15 }
  0x1a   : > { %200 = vadd.xlane.f32.xlu1 %v199_v16 }
  0x1b   : > { %194 = vadd.xlane.f32.xlu2 %v193_v17 }
  0x21   : > { %191 = vadd.xlane.f32.xlu0 %v190_v22 }
  0x22   : > { %188 = vadd.xlane.f32.xlu1 %v187_v23 }
  0x84   : > { %v210_v24 = vpop.xlane.xlu0 %209 }
  0x85   : > { %v218_v25 = vmul.f32 0.00390625, %v210_v24  ;;  %v204_v26 = vpop.xlane.xlu1 %203 }
  0x86   : > { %v198_v27 = vpop.xlane.xlu2 %197  ;;  %v216_v31 = vmul.f32 0.00390625, %v204_v26 }
  0x87   : > { %232 = vmatpush.msra.mxu0 %v218_v25  ;;  %v214_v34 = vmul.f32 0.00390625, %v198_v27 }
  0x8c   : > { %v207_v28 = vpop.xlane.xlu0 %206 }
  0x8d   : > { %v217_v29 = vmul.f32 0.00390625, %v207_v28  ;;  %v201_v30 = vpop.xlane.xlu1 %200 }
  0x8e   : > { %v215_v32 = vmul.f32 0.00390625, %v201_v30  ;;  %v195_v33 = vpop.xlane.xlu2 %194 }
  0x8f   : > { %233 = vmatpush.msra.mxu0 %v217_v29  ;;  %v213_v35 = vmul.f32 0.00390625, %v195_v33 }
  0x91   : > { %234 = vmatpush.msra.mxu0 %v216_v31 }
  0x93   : > { %235 = vmatpush.msra.mxu0 %v215_v32 }
  0x94   : > { %v192_v36 = vpop.xlane.xlu0 %191 }
  0x95   : > { %236 = vmatpush.msra.mxu0 %v214_v34  ;;  %v212_v37 = vmul.f32 0.00390625, %v192_v36  ;;  %v189_v38 = vpop.xlane.xlu1 %188 }
  0x96   : > { %v211_v39 = vmul.f32 0.00390625, %v189_v38 }
  0x97   : > { %237 = vmatpush.msra.mxu0 %v213_v35 }
  0x99   : > { %238 = vmatpush.msra.mxu0 %v212_v37 }
  0x9b   : > { %239 = vmatpush.msra.mxu0 %v211_v39 }
  0x9c   : > { %611 = vmatmul.msk.f32.vlgmr.msra.gmra.mxu0 %vm220_vm0, %v219_v40 }
 0x119   : > { %v241_v41 = vpop.f32.mrf.mxu0 }
 0x11a   : > { %v244_v42 = vmax.f32 %v241_v41, 0.0 }
 0x11c   : > { %612 = vmatpush.msk.msra.mxu1 %vm278_vm1, %v244_v42  ;;  %625 = vmatpush.msk.msra.mxu2 %vm278_vm1, %v244_v42 }
 0x11d   : > { %626 = vmatpush.msk.msra.mxu3 %vm278_vm1, %v244_v42  ;;  %613 = vmatmul.msk.f32.vlgmr.msra.gmra.mxu1 %vm253_vm2, %v245_v43 }
 0x11e   : > { %616 = vmatmul.msk.f32.vlgmr.msra.gmra.mxu2 %vm253_vm2, %v248_v44  ;;  %619 = vmatmul.msk.f32.vlgmr.msra.gmra.mxu3 %vm253_vm2, %v251_v45 }
 0x125   : > { %614 = vmatmul.msk.f32.gmra.mxu1 %vm253_vm2, %v246_v46 }
 0x126   : > { %617 = vmatmul.msk.f32.gmra.mxu2 %vm253_vm2, %v249_v47  ;;  %620 = vmatmul.msk.f32.gmra.mxu3 %vm253_vm2, %v252_v48 }
 0x12d   : > { %615 = vmatmul.msk.f32.gmra.mxu1 %vm253_vm2, %v247_v49 }
 0x12e   : > { %618 = vmatmul.msk.f32.gmra.mxu2 %vm253_vm2, %v250_v50 }
 0x19a   : > { %v299_v51 = vpop.f32.mrf.mxu1 }
 0x19b   : > { %v323_v53 = vsub.f32 0.0, %v299_v51 }
 0x19d   : > { %v331_v54 = vmul.f32 1.442695, %v323_v53 }
 0x19f   : > { %639 = vpow2.f32 %v331_v54 }
 0x1a1   : > { %v308_v55 = vpop.f32.mrf.mxu2  ;;  %v317_v56 = vpop.f32.mrf.mxu3 }
 0x1a2   : > { %v326_v57 = vsub.f32 0.0, %v308_v55  ;;  %v302_v58 = vpop.f32.mrf.mxu1  ;;  %v329_v59 = vsub.f32 0.0, %v317_v56 }
 0x1a3   : > { %v324_v60 = vsub.f32 0.0, %v302_v58 }
 0x1a4   : > { %v337_v61 = vmul.f32 1.442695, %v326_v57  ;;  %v343_v3 = vmul.f32 1.442695, %v329_v59 }
 0x1a5   : > { %v640_v62 = vpop.eup %639  ;;  %v333_v63 = vmul.f32 1.442695, %v324_v60 }
 0x1a6   : > { %v347_v5 = vadd.f32 1.0, %v640_v62  ;;  %641 = vpow2.f32 %v337_v61 }
 0x1a7   : > { %643 = vpow2.f32 %v333_v63 }
 0x1a8   : > { %645 = vrcp.f32 %v347_v5  ;;  %v366_v38 = vand.u32 2147483648, %v347_v5  ;;  %v364_v40 = vand.u32 2147483647, %v347_v5  ;;  %vm360_vm4 = vweird.f32 %v347_v5 }
 0x1a9   : > { %647 = vpow2.f32 %v343_v3  ;;  %v311_v8 = vpop.f32.mrf.mxu2  ;;  %v320_v15 = vpop.f32.mrf.mxu3 }
 0x1aa   : > { %v327_v16 = vsub.f32 0.0, %v311_v8  ;;  %v305_v17 = vpop.f32.mrf.mxu1  ;;  %v330_v23 = vsub.f32 0.0, %v320_v15  ;;  %v367_v47 = vor.u32 1.1754944e-38, %v366_v38  ;;  %vm365_vm6 = vcmp.eq.f32.partialorder %v364_v40, 8.507059e+37 }
 0x1ab   : > { %v325_v22 = vsub.f32 0.0, %v305_v17 }
 0x1ac   : > { %v642_v24 = vpop.eup %641  ;;  %v339_v25 = vmul.f32 1.442695, %v327_v16  ;;  %v345_v32 = vmul.f32 1.442695, %v330_v23 }
 0x1ad   : > { %v644_v26 = vpop.eup %643  ;;  %v799_v27 = vadd.f32 1.0, %v642_v24  ;;  %v335_v28 = vmul.f32 1.442695, %v325_v22 }
 0x1ae   : > { %v646_v29 = vpop.eup %645  ;;  %v801_v30 = vadd.f32 1.0, %v644_v26  ;;  %649 = vpow2.f32 %v339_v25 }
 0x1af   : > { %v648_v31 = vpop.eup %647  ;;  %651 = vrcp.f32 %v799_v27  ;;  %v356_v33 = vmul.f32 %v646_v29, %v347_v5  ;;  %vm361_vm3 = vweird.f32 %v646_v29  ;;  %v411_v56 = vand.u32 2147483648, %v799_v27 }
 0x1b0   : > { %653 = vrcp.f32 %v801_v30  ;;  %v805_v34 = vadd.f32 1.0, %v648_v31  ;;  %vm362_vm5 = vmor %vm360_vm4, %vm361_vm3  ;;  %v381_v58 = vand.u32 2147483648, %v801_v30  ;;  %v409_v62 = vand.u32 2147483647, %v799_v27 }
 0x1b1   : > { %655 = vpow2.f32 %v335_v28  ;;  %v314_v35 = vpop.f32.mrf.mxu2  ;;  %v357_v36 = vsub.f32 1.0, %v356_v33  ;;  %v379_v3 = vand.u32 2147483647, %v801_v30  ;;  %vm405_vm9 = vweird.f32 %v799_v27 }
 0x1b2   : > { %v328_v37 = vsub.f32 0.0, %v314_v35  ;;  %657 = vpow2.f32 %v345_v32  ;;  %vm375_vm10 = vweird.f32 %v801_v30  ;;  %v412_v17 = vor.u32 1.1754944e-38, %v411_v56 }
 0x1b3   : > { %v358_v39 = vmul.f32 %v646_v29, %v357_v36  ;;  %659 = vrcp.f32 %v805_v34  ;;  %v382_v25 = vor.u32 1.1754944e-38, %v381_v58  ;;  %vm410_vm13 = vcmp.eq.f32.partialorder %v409_v62, 8.507059e+37 }
 0x1b4   : > { %v650_v41 = vpop.eup %649  ;;  %v341_v42 = vmul.f32 1.442695, %v328_v37  ;;  %vm380_vm14 = vcmp.eq.f32.partialorder %v379_v3, 8.507059e+37  ;;  %vm450_vm1 = vweird.f32 %v805_v34 }
 0x1b5   : > { %v652_v43 = vpop.eup %651  ;;  %v808_v44 = vadd.f32 1.0, %v650_v41  ;;  %v359_v45 = vadd.f32 %v646_v29, %v358_v39 }
 0x1b6   : > { %v654_v46 = vpop.eup %653  ;;  %661 = vpow2.f32 %v341_v42  ;;  %v401_v48 = vmul.f32 %v652_v43, %v799_v27  ;;  %vm406_vm7 = vweird.f32 %v652_v43 }
 0x1b7   : > { %v656_v49 = vpop.eup %655  ;;  %663 = vrcp.f32 %v808_v44  ;;  %v363_v50 = vsel %vm362_vm5, %v646_v29, %v359_v45  ;;  %v371_v51 = vmul.f32 %v654_v46, %v801_v30  ;;  %vm376_vm8 = vweird.f32 %v654_v46  ;;  %vm407_vm11 = vmor %vm405_vm9, %vm406_vm7 }
 0x1b8   : > { %v813_v52 = vadd.f32 1.0, %v656_v49  ;;  %v368_v53 = vsel %vm365_vm6, %v367_v47, %v363_v50  ;;  %v402_v54 = vsub.f32 1.0, %v401_v48  ;;  %v658_v55 = vpop.eup %657  ;;  %vm377_vm12 = vmor %vm375_vm10, %vm376_vm8  ;;  %v426_v36 = vand.u32 2147483648, %v808_v44 }
 0x1b9   : > { %477 = vperm.xlu2 %636, %v368_v53   ;;  %v372_v57 = vsub.f32 1.0, %v371_v51  ;;  %v817_v59 = vpop.eup %659  ;;  %v820_v60 = vadd.f32 1.0, %v658_v55  ;;  %v424_v37 = vand.u32 2147483647, %v808_v44  ;;  %vm420_vm0 = vweird.f32 %v808_v44 }
 0x1ba   : > { %665 = vrcp.f32 %v813_v52  ;;  %v403_v61 = vmul.f32 %v652_v43, %v402_v54  ;;  %v446_v23 = vmul.f32 %v817_v59, %v805_v34  ;;  %v396_v41 = vand.u32 2147483648, %v813_v52 }
 0x1bb   : > { %v373_v63 = vmul.f32 %v654_v46, %v372_v57  ;;  %667 = vrcp.f32 %v820_v60  ;;  %v394_v45 = vand.u32 2147483647, %v813_v52  ;;  %v427_v48 = vor.u32 1.1754944e-38, %v426_v36 }
 0x1bc   : > { %v662_v5 = vpop.eup %661  ;;  %v404_v8 = vadd.f32 %v652_v43, %v403_v61  ;;  %v447_v33 = vsub.f32 1.0, %v446_v23  ;;  %vm390_vm4 = vweird.f32 %v813_v52  ;;  %vm425_vm5 = vcmp.eq.f32.partialorder %v424_v37, 8.507059e+37 }
 0x1bd   : > { %v664_v15 = vpop.eup %663  ;;  %v826_v16 = vadd.f32 1.0, %v662_v5  ;;  %v374_v22 = vadd.f32 %v654_v46, %v373_v63  ;;  %vm451_vm6 = vweird.f32 %v817_v59  ;;  %v397_v53 = vor.u32 1.1754944e-38, %v396_v41 }
 0x1be   : > { %v408_v24 = vsel %vm407_vm11, %v652_v43, %v404_v8  ;;  %v416_v26 = vmul.f32 %v664_v15, %v808_v44  ;;  %vm421_vm15 = vweird.f32 %v664_v15  ;;  %v456_v54 = vand.u32 2147483648, %v805_v34  ;;  %vm850_vm9 = vmor %vm450_vm1, %vm451_vm6 }
 0x1bf   : > { %669 = vrcp.f32 %v826_v16  ;;  %v378_v27 = vsel %vm377_vm12, %v654_v46, %v374_v22  ;;  %v413_v29 = vsel %vm410_vm13, %v412_v17, %v408_v24  ;;  %vm422_vm2 = vmor %vm420_vm0, %vm421_vm15  ;;  %v448_v46 = vmul.f32 %v817_v59, %v447_v33 }
 0x1c0   : > { %v666_v28 = vpop.eup %665  ;;  %v383_v30 = vsel %vm380_vm14, %v382_v25, %v378_v27  ;;  %v417_v31 = vsub.f32 1.0, %v416_v26  ;;  %vm395_vm8 = vcmp.eq.f32.partialorder %v394_v45, 8.507059e+37  ;;  %v457_v3 = vor.u32 1.1754944e-38, %v456_v54 }
 0x1c1   : > { %492 = vperm.xlu2 %636, %v413_v29   ;;  %482 = vperm.xlu0 %637, %v383_v30   ;;  %v386_v32 = vmul.f32 %v666_v28, %v813_v52  ;;  %v668_v39 = vpop.eup %667  ;;  %vm391_vm3 = vweird.f32 %v666_v28  ;;  %v449_v57 = vadd.f32 %v817_v59, %v448_v46  ;;  %v454_v52 = vand.u32 2147483647, %v805_v34 }
 0x1c2   : > { %v418_v35 = vmul.f32 %v664_v15, %v417_v31  ;;  %v461_v50 = vmul.f32 %v668_v39, %v820_v60  ;;  %vm392_vm7 = vmor %vm390_vm4, %vm391_vm3  ;;  %v441_v8 = vand.u32 2147483648, %v826_v16  ;;  %vm435_vm12 = vweird.f32 %v826_v16 }
 0x1c3   : > { %v387_v38 = vsub.f32 1.0, %v386_v32  ;;  %vm455_vm11 = vcmp.eq.f32.partialorder %v454_v52, 8.507059e+37  ;;  %v439_v34 = vand.u32 2147483647, %v826_v16  ;;  %vm465_vm15 = vweird.f32 %v820_v60 }
 0x1c4   : > { %v419_v40 = vadd.f32 %v664_v15, %v418_v35  ;;  %v462_v63 = vsub.f32 1.0, %v461_v50  ;;  %v442_v24 = vor.u32 1.1754944e-38, %v441_v8  ;;  %vm466_vm0 = vweird.f32 %v668_v39 }
 0x1c5   : > { %v670_v42 = vpop.eup %669  ;;  %v388_v43 = vmul.f32 %v666_v28, %v387_v38  ;;  %vm440_vm14 = vcmp.eq.f32.partialorder %v439_v34, 8.507059e+37  ;;  %v471_v26 = vand.u32 2147483648, %v820_v60  ;;  %v469_v27 = vand.u32 2147483647, %v820_v60  ;;  %vm467_vm1 = vmor %vm465_vm15, %vm466_vm0 }
 0x1c6   : > { %v423_v47 = vsel %vm422_vm2, %v664_v15, %v419_v40  ;;  %v431_v49 = vmul.f32 %v670_v42, %v826_v16  ;;  %vm436_vm10 = vweird.f32 %v670_v42  ;;  %v453_v15 = vsel %vm850_vm9, %v817_v59, %v449_v57 }
 0x1c7   : > { %v389_v44 = vadd.f32 %v666_v28, %v388_v43  ;;  %v428_v51 = vsel %vm425_vm5, %v427_v48, %v423_v47  ;;  %vm437_vm13 = vmor %vm435_vm12, %vm436_vm10  ;;  %v463_v22 = vmul.f32 %v668_v39, %v462_v63  ;;  %v458_v23 = vsel %vm455_vm11, %v457_v3, %v453_v15 }
 0x1c8   : > { %v432_v55 = vsub.f32 1.0, %v431_v49  ;;  %v472_v16 = vor.u32 1.1754944e-38, %v471_v26  ;;  %vm470_vm2 = vcmp.eq.f32.partialorder %v469_v27, 8.507059e+37 }
 0x1c9   : > { %497 = vperm.xlu2 %636, %v428_v51   ;;  %v393_v56 = vsel %vm392_vm7, %v666_v28, %v389_v44  ;;  %v464_v59 = vadd.f32 %v668_v39, %v463_v22 }
 0x1ca   : > { %v398_v58 = vsel %vm395_vm8, %v397_v53, %v393_v56  ;;  %v433_v62 = vmul.f32 %v670_v42, %v432_v55 }
 0x1cb   : > { %487 = vperm.xlu1 %638, %v398_v58   ;;  %v468_v28 = vsel %vm467_vm1, %v668_v39, %v464_v59 }
 0x1cc   : > { %v434_v5 = vadd.f32 %v670_v42, %v433_v62  ;;  %v473_v29 = vsel %vm470_vm2, %v472_v16, %v468_v28 }
 0x1ce   : > { %v438_v17 = vsel %vm437_vm13, %v670_v42, %v434_v5 }
 0x1cf   : > { %v443_v25 = vsel %vm440_vm14, %v442_v24, %v438_v17 }
 0x1d1   : > { %507 = vperm.xlu2 %636, %v458_v23  }
 0x1d3   : > { %502 = vperm.xlu1 %638, %v443_v25  }
 0x1db   : > { %512 = vperm.xlu1 %638, %v473_v29  }
 0x213   : > { %v478_v30 = vpop.permute.xlu2 %477 }
 0x214   : > { %v515_v60 = vmul.f32 %v478_v30, %v756_v20  ;;  %v516_v31 = vmul.f32 %v478_v30, %v758_v21 }
 0x216   : > { %531 = vst [vmem:[%s868_s11] sm:$0xff] %v515_v60 }
 0x217   : > { %532 = vst [vmem:[%s868_s11 + $0x8] sm:$0xff] %v516_v31 }
 0x21b   : > { %v493_v32 = vpop.permute.xlu2 %492 }
 0x21c   : > { %v521_v33 = vmul.f32 %v493_v32, %v728_v6  ;;  %v522_v35 = vmul.f32 %v493_v32, %v730_v7 }
 0x21e   : > { %537 = vst [vmem:[%s868_s11 + $0x30] sm:$0xff] %v521_v33 }
 0x21f   : > { %538 = vst [vmem:[%s868_s11 + $0x38] sm:$0xff] %v522_v35 }
 0x223   : > { %v498_v36 = vpop.permute.xlu2 %497 }
 0x224   : > { %v523_v37 = vmul.f32 %v498_v36, %v738_v11  ;;  %v524_v20 = vmul.f32 %v498_v36, %v740_v12 }
 0x226   : > { %539 = vst [vmem:[%s868_s11 + $0x40] sm:$0xff] %v523_v37 }
 0x227   : > { %540 = vst [vmem:[%s868_s11 + $0x48] sm:$0xff] %v524_v20 }
 0x22b   : > { %v508_v21 = vpop.permute.xlu2 %507 }
 0x22c   : > { %v527_v38 = vmul.f32 %v508_v21, %v734_v9  ;;  %v528_v6 = vmul.f32 %v508_v21, %v736_v10 }
 0x22e   : > { %543 = vst [vmem:[%s868_s11 + $0x60] sm:$0xff] %v527_v38 }
 0x22f   : > { %544 = vst [vmem:[%s868_s11 + $0x68] sm:$0xff] %v528_v6 }
 0x233   : > { %v483_v7 = vpop.permute.xlu0 %482 }
 0x234   : > { %v517_v39 = vmul.f32 %v483_v7, %v752_v18  ;;  %v518_v11 = vmul.f32 %v483_v7, %v754_v19 }
 0x236   : > { %533 = vst [vmem:[%s868_s11 + $0x10] sm:$0xff] %v517_v39 }
 0x237   : > { %534 = vst [vmem:[%s868_s11 + $0x18] sm:$0xff] %v518_v11 }
 0x23d   : > { %v488_v12 = vpop.permute.xlu1 %487 }
 0x23e   : > { %v519_v40 = vmul.f32 %v488_v12, %v742_v13  ;;  %v520_v9 = vmul.f32 %v488_v12, %v744_v14 }
 0x240   : > { %535 = vst [vmem:[%s868_s11 + $0x20] sm:$0xff] %v519_v40 }
 0x241   : > { %536 = vst [vmem:[%s868_s11 + $0x28] sm:$0xff] %v520_v9 }
 0x245   : > { %v503_v10 = vpop.permute.xlu1 %502 }
 0x246   : > { %v525_v41 = vmul.f32 %v503_v10, %v720_v2  ;;  %v526_v42 = vmul.f32 %v503_v10, %v724_v4 }
 0x248   : > { %541 = vst [vmem:[%s868_s11 + $0x50] sm:$0xff] %v525_v41 }
 0x249   : > { %542 = vst [vmem:[%s868_s11 + $0x58] sm:$0xff] %v526_v42 }
 0x24d   : > { %v513_v18 = vpop.permute.xlu1 %512 }
 0x24e   : > { %v529_v19 = vmul.f32 %v513_v18, %v716_v0  ;;  %v530_v43 = vmul.f32 %v513_v18, %v718_v1 }
 0x250   : > { %545 = vst [vmem:[%s868_s11 + $0x70] sm:$0xff] %v529_v19 }
 0x251   : > { %546 = vst [vmem:[%s868_s11 + $0x78] sm:$0xff] %v530_v43 }
 0x252 PF: > { %s13_s12 = sadd.s32 1, %s677_s12  }
 0x253   : > { %p10_p4 = scmp.ge.s32.totalorder %s13_s12, 4  }
 0x255   :  { %12 = sbr.rel (!%p10_p4) target bundleno = 1 (0x1), region = 62 }

</bundles_post_ra>
